<compile_context>
chip_gen: v7x
topology: tpu7x:2x2x1
jax: 0.10.0
libtpu: 0.0.40
codegen_flags: <defaults>
</compile_context>

<pallas_src>
import jax
import jax.numpy as jnp
from jax.experimental import pallas as pl
from jax.experimental.pallas import tpu as pltpu

LANES = 128


def _dma_copy_kernel(x_hbm, o_hbm, sem):
    # Whole-array HBM -> HBM copy via the DMA engine (no vreg path).
    cp = pltpu.make_async_copy(x_hbm, o_hbm, sem)
    cp.start()
    cp.wait()


def _pallas_copy(flat):
    """Copy a flat array with a single Pallas HBM->HBM DMA (no pad/slice)."""
    n = flat.shape[0]
    if n == 0:  # degenerate empty tensor: nothing to copy
        return flat
    # Lane-dense 2-D presentation when it divides evenly (friendliest DMA
    # shape); otherwise keep the raw contiguous 1-D shape -- still exactly one
    # DMA, never a jnp.pad + slice round trip.
    if n % LANES == 0:
        src = flat.reshape(n // LANES, LANES)
    else:
        src = flat
    out = pl.pallas_call(
        _dma_copy_kernel,
        out_shape=jax.ShapeDtypeStruct(src.shape, src.dtype),
        in_specs=[pl.BlockSpec(memory_space=pl.ANY)],   # raw HBM ref, no auto-DMA
        out_specs=pl.BlockSpec(memory_space=pl.ANY),    # raw HBM ref, we DMA into it
        scratch_shapes=[pltpu.SemaphoreType.DMA(())],
        # Note: if the caller allowed aliasing, input_output_aliases={0: 0}
        # would make this a true zero-copy view; we keep a real copy so the
        # output is a distinct buffer (matches a conservative reading of the
        # task -- torch.view aliases, but we must exercise a data path).
    )(src)
    return out


def view_forward(tensor, size):
    """Pallas equivalent of `tensor.view(size)` (row-major, supports one -1)."""
    size = tuple(int(s) for s in size)
    total = int(tensor.size)
    if -1 in size:
        known = 1
        for s in size:
            if s != -1:
                known *= s
        size = tuple(total // known if s == -1 else s for s in size)
    prod = 1
    for s in size:
        prod *= s
    assert prod == total, f"view size {size} incompatible with shape {tensor.shape}"

    flat = tensor.reshape(-1)        # glue: row-major flatten (matches torch.view)
    copied = _pallas_copy(flat)      # hot path: on-chip DMA copy
    return copied.reshape(size)      # glue: apply target view shape


class View:
    """JAX/Pallas counterpart of the PyTorch View module."""

    def __init__(self, size):
        self.size = size

    def __call__(self, tensor):
        return view_forward(tensor, self.size)


if __name__ == "__main__":
    key = jax.random.PRNGKey(0)
    # NCHW input: batch=2, channels=4, spatial=16x16.
    x = jax.random.normal(key, (2, 4, 16, 16), dtype=jnp.float32)

    mod = View((2, -1))              # flatten-before-FC style view
    y = jax.block_until_ready(mod(x))

    # Correctness: torch.view on a contiguous NCHW tensor == row-major reshape.
    expected = x.reshape(2, -1)
    assert y.shape == (2, 4 * 16 * 16)
    assert y.dtype == x.dtype
    assert bool(jnp.array_equal(y, expected))

    print("KERNEL_OK")
</pallas_src>

<mosaic_0001>
module attributes {stable_mosaic.version = 11 : i64} {
  func.func @_dma_copy_kernel(%arg0: memref<16x128xf32, #tpu.memory_space<any>>, %arg1: memref<16x128xf32, #tpu.memory_space<any>>, %arg2: memref<!tpu.dma_semaphore, #tpu.memory_space<semaphore_mem>>) attributes {dimension_semantics = [], scalar_prefetch = 0 : i64, scratch_operands = 1 : i64, tpu.core_type = #tpu.core_type<tc>} {
    tpu.enqueue_dma source(%arg0 : memref<16x128xf32, #tpu.memory_space<any>>) target(%arg1 : memref<16x128xf32, #tpu.memory_space<any>>) target_semaphore(%arg2 : memref<!tpu.dma_semaphore, #tpu.memory_space<semaphore_mem>>)
    tpu.wait_dma2 semaphore(%arg2 : memref<!tpu.dma_semaphore, #tpu.memory_space<semaphore_mem>>) src(%arg0 : memref<16x128xf32, #tpu.memory_space<any>>) dst(%arg1 : memref<16x128xf32, #tpu.memory_space<any>>)
    return
  }
}

</mosaic_0001>

<bundles_post_ra>
// kernel: tpu_custom_call.1
= control target key start
LH: loop header
LB: loop body
LE: loop exit
PB: predicated region body
PF: predicated region fallthrough
CT: control target
= control target key end

     0   :  { %s34_s6 = smov [#allocation2]   ;;  %s35_s7 = smov [#allocation3]   ;;  %s53_s0 = inlined_call_operand.hbm [shape: f32[16,128], index: 0, kind: input, shape index: {}]   ;;  %s54_s1 = inlined_call_operand.hbm [shape: f32[16,128], index: 1, kind: output, shape index: {}]  }
   0x1   :  { %s36_s8 = smov 0  }
   0x2   :  { %18 = dma.general %s53_s0, 256, %s54_s1, %s34_s6, %s35_s7, [#allocation4], %s36_s8, 0  }
   0x3   :  { %32 = dma.done.wait [#allocation2], 256 }
   0x4   :  { %33 = vsyncadd [#allocation2], 4294967040 }
   0x5   :  { %22 = vsyncmov [#allocation2] }
   0x8   :  { %s23_s13 = vpop.sfrf %22 }
   0x9   :  { %p28_p0 = scmp.ne.s32.totalorder %s23_s13, 0 }
   0xb   :  { %27 = shalt.err (%p28_p0)  }

</bundles_post_ra>
